<compile_context>
chip_gen: v5e
topology: v5e:2x2
jax: 0.10.0
libtpu: 0.0.40
codegen_flags: <defaults>
</compile_context>

<pallas_src>
import jax
import jax.numpy as jnp
from jax import lax
from jax.experimental import pallas as pl
from jax.experimental.pallas import tpu as pltpu


def _raymarch_kernel(scalars_ref, colors_ref, sdfs_ref, depths_ref,
                     rgb_ref, depth_ref, weights_ref):
    inv_beta = scalars_ref[0]     # 1/beta, precomputed on host (no vector div)
    d_min = scalars_ref[1]
    d_max = scalars_ref[2]

    depths = depths_ref[...].astype(jnp.float32)      # [S, TN]
    sdfs = sdfs_ref[...].astype(jnp.float32)          # [S, TN]
    S, TN = depths.shape
    C = colors_ref.shape[0]

    row = lax.broadcasted_iota(jnp.int32, (S, TN), 0)  # sublane index, hoisted

    # deltas[s] = depths[s+1] - depths[s]; last bin is "infinite" (1e9).
    # roll(shift=S-1) -> depths[(s+1) mod S]; the wrapped row is masked out.
    depths_next = pltpu.roll(depths, shift=S - 1, axis=0)
    deltas = jnp.where(row == S - 1, jnp.float32(1e9), depths_next - depths)

    # density_func: deterministic VolSDF-style sigmoid SDF -> density
    densities = jax.nn.sigmoid(-(sdfs * inv_beta)) * inv_beta  # [S, TN]
    alpha = 1.0 - jnp.exp(-densities * deltas)                 # [S, TN]

    # weights[s] = alpha[s] * prod_{j<s} (1 - alpha[j] + 1e-10)
    # Exclusive cumprod along S: linear-space Hillis–Steele multiply scan over
    # the sublane axis; shifts go to the XLU (roll) + VPU (select).
    def shift_down_ones(x, k):
        # result[s] = x[s - k] for s >= k, 1.0 otherwise
        rolled = pltpu.roll(x, shift=k, axis=0)
        return jnp.where(row < k, jnp.float32(1.0), rolled)

    c = 1.0 - alpha + 1e-10                                    # [S, TN]
    k = 1
    while k < S:                                               # ceil(log2(S)) steps
        c = c * shift_down_ones(c, k)
        k *= 2
    trans = shift_down_ones(c, 1)                              # exclusive cumprod
    weights = alpha * trans                                    # [S, TN]
    weights_ref[...] = weights                                 # single full-tile store

    weight_total = jnp.sum(weights, axis=0, keepdims=True)     # [1, TN]

    # composite rgb: colors loaded late, per channel, so the big operand is
    # not live across the scan above.
    comp_rows = []
    for ch in range(C):
        col = colors_ref[ch].astype(jnp.float32)               # [S, TN]
        comp_rows.append(jnp.sum(weights * col, axis=0, keepdims=True))
    comp_rgb = jnp.concatenate(comp_rows, axis=0)              # [C, TN]
    rgb_ref[...] = (comp_rgb + 1.0 - weight_total) * 2.0 - 1.0

    # composite depth: last sample's weight bumped by (1 - weight_total);
    # exact divide on the single [1, TN] row (cheap, matches reference).
    depth_num = (jnp.sum(weights * depths, axis=0, keepdims=True)
                 + (1.0 - weight_total) * depths[S - 1:S, :])
    comp_depth = depth_num / weight_total
    comp_depth = jnp.where(jnp.isnan(comp_depth), jnp.inf, comp_depth)
    depth_ref[...] = jnp.clip(comp_depth, d_min, d_max)


def _device_budget():
    """(tile cap, vmem_limit_bytes, preferred grid multiple) per TPU generation."""
    kind = ""
    try:
        kind = jax.devices()[0].device_kind.lower()
    except Exception:
        pass
    if "v7" in kind:                       # 64 MiB VMEM, 2 TCs -> even grid
        return 16384, 48 * 1024 * 1024, 2
    if "v5e" in kind or "v5 lite" in kind or "v5litepod" in kind:
        return 32768, 64 * 1024 * 1024, 1  # single TC, 16 MiB scoped default
    return 32768, 64 * 1024 * 1024, 2      # v6e / default: 128 MiB VMEM, 2 TCs


def _choose_tile_n(N, cap, grid_mult):
    """Largest 128-multiple dividing N under cap; prefer >=4 steps and a grid
    that is a multiple of the TensorCore count (megacore balance)."""
    cands = [t for t in range(128, min(cap, N) + 1, 128) if N % t == 0]
    for min_steps, mult in ((4, grid_mult), (2, grid_mult), (1, 1)):
        ok = [t for t in cands if (N // t) >= min_steps and (N // t) % mult == 0]
        if ok:
            return max(ok)
    return max(cands)


def sdf2density_raymarch(colors, sdfs, depths, *, beta=0.1, tile_n=None,
                         lane_major_outputs=False):
    """colors: [B, R, S, C], sdfs/depths: [B, R, S, 1] (PyTorch convention).

    Inputs may be float32 or bfloat16; they are DMA'd in their own dtype and
    cast to f32 inside the kernel. Outputs are float32.
    """
    B, R, S, C = colors.shape
    N = B * R
    assert N % 128 == 0, "B*R must be a multiple of 128"

    cap, vmem_bytes, grid_mult = _device_budget()
    if tile_n is None:
        tile_n = _choose_tile_n(N, cap, grid_mult)
    assert N % tile_n == 0 and tile_n % 128 == 0

    # glue: transpose to kernel layout (rays on the lane axis).
    # TODO(synk): one extra HBM pass per tensor; removable only if the
    #             pipeline feeds/consumes the lane-major layout natively.
    colors_k = jnp.transpose(colors.reshape(N, S, C), (2, 1, 0))   # [C, S, N]
    sdfs_k = jnp.transpose(sdfs.reshape(N, S), (1, 0))             # [S, N]
    depths_k = jnp.transpose(depths.reshape(N, S), (1, 0))         # [S, N]

    # Global clip bounds (matches the reference for arbitrary depth ordering).
    d_min = jnp.min(depths).astype(jnp.float32)
    d_max = jnp.max(depths).astype(jnp.float32)
    scalars = jnp.stack([jnp.float32(1.0 / beta), d_min, d_max])   # [3] -> SMEM

    grid = (N // tile_n,)
    rgb_k, depth_k, weights_k = pl.pallas_call(
        _raymarch_kernel,
        out_shape=(jax.ShapeDtypeStruct((C, N), jnp.float32),
                   jax.ShapeDtypeStruct((1, N), jnp.float32),
                   jax.ShapeDtypeStruct((S, N), jnp.float32)),
        grid=grid,
        in_specs=[
            pl.BlockSpec(memory_space=pltpu.MemorySpace.SMEM),     # scalars
            pl.BlockSpec((C, S, tile_n), lambda i: (0, 0, i)),     # colors
            pl.BlockSpec((S, tile_n), lambda i: (0, i)),           # sdfs
            pl.BlockSpec((S, tile_n), lambda i: (0, i)),           # depths
        ],
        out_specs=(
            pl.BlockSpec((C, tile_n), lambda i: (0, i)),           # composite rgb
            pl.BlockSpec((1, tile_n), lambda i: (0, i)),           # composite depth
            pl.BlockSpec((S, tile_n), lambda i: (0, i)),           # weights
        ),
        compiler_params=pltpu.CompilerParams(
            dimension_semantics=("parallel",),
            vmem_limit_bytes=vmem_bytes),
    )(scalars, colors_k, sdfs_k, depths_k)

    if lane_major_outputs:
        # rgb [C, N], depth [1, N], weights [S, N] — no output transposes.
        return rgb_k, depth_k, weights_k

    # glue: back to PyTorch convention
    composite_rgb = jnp.transpose(rgb_k, (1, 0)).reshape(B, R, C)
    composite_depth = jnp.transpose(depth_k, (1, 0)).reshape(B, R, 1)
    weights = jnp.transpose(weights_k, (1, 0)).reshape(B, R, S, 1)
    return composite_rgb, composite_depth, weights


def _reference(colors, sdfs, depths, beta=0.1):
    """Plain-JAX transcription of Sdf2DensityRayMarcher.run_forward."""
    deltas = depths[:, :, 1:] - depths[:, :, :-1]
    deltas_inf = 1e9 * jnp.ones_like(deltas[:, :, :1])
    deltas = jnp.concatenate([deltas, deltas_inf], axis=-2)
    densities = jax.nn.sigmoid(-sdfs / beta) / beta
    density_delta = densities * deltas
    alpha = 1.0 - jnp.exp(-density_delta)
    alpha_shifted = jnp.concatenate(
        [jnp.ones_like(alpha[:, :, :1]), 1.0 - alpha + 1e-10], axis=-2)
    weights = alpha * jnp.cumprod(alpha_shifted, axis=-2)[:, :, :-1]
    composite_rgb = jnp.sum(weights * colors, axis=-2)
    weight_total = weights.sum(axis=2)
    weights_depth = weights.at[:, :, -1].add(1.0 - weight_total)
    composite_depth = jnp.sum(weights_depth * depths, axis=-2) / weight_total
    composite_depth = jnp.where(jnp.isnan(composite_depth), jnp.inf,
                                composite_depth)
    composite_depth = jnp.clip(composite_depth, jnp.min(depths),
                               jnp.max(depths))
    composite_rgb = composite_rgb + 1.0 - weight_total
    composite_rgb = composite_rgb * 2.0 - 1.0
    return composite_rgb, composite_depth, weights


if __name__ == "__main__":
    key = jax.random.PRNGKey(0)
    B, R, S, C = 2, 128, 8, 3     # batch, rays per batch, samples per ray, rgb

    k_c, k_s, k_d = jax.random.split(key, 3)
    colors = jax.random.uniform(k_c, (B, R, S, C), dtype=jnp.float32)
    sdfs = 0.2 * jax.random.normal(k_s, (B, R, S, 1), dtype=jnp.float32)
    depths_raw = jax.random.uniform(k_d, (B, R, S, 1), dtype=jnp.float32,
                                    minval=0.5, maxval=3.0)
    depths = jnp.sort(depths_raw, axis=2)     # monotonically increasing depths

    out_rgb, out_depth, out_w = sdf2density_raymarch(colors, sdfs, depths)
    jax.block_until_ready((out_rgb, out_depth, out_w))

    ref_rgb, ref_depth, ref_w = _reference(colors, sdfs, depths)
    assert out_rgb.shape == (B, R, C)
    assert out_depth.shape == (B, R, 1)
    assert out_w.shape == (B, R, S, 1)
    assert jnp.allclose(out_rgb, ref_rgb, atol=1e-3, rtol=1e-3)
    assert jnp.allclose(out_depth, ref_depth, atol=1e-3, rtol=1e-3)
    assert jnp.allclose(out_w, ref_w, atol=1e-3, rtol=1e-3)

    print("KERNEL_OK")
</pallas_src>

<mosaic_0001>
module attributes {stable_mosaic.version = 11 : i64} {
  func.func @_raymarch_kernel(%arg0: i32, %arg1: memref<3xf32, #tpu.memory_space<smem>>, %arg2: memref<3x8x128xf32, #tpu.memory_space<vmem>>, %arg3: memref<8x128xf32, #tpu.memory_space<vmem>>, %arg4: memref<8x128xf32, #tpu.memory_space<vmem>>, %arg5: memref<3x128xf32, #tpu.memory_space<vmem>>, %arg6: memref<1x128xf32, #tpu.memory_space<vmem>>, %arg7: memref<8x128xf32, #tpu.memory_space<vmem>>) attributes {dimension_semantics = [#tpu.dimension_semantics<parallel>], iteration_bounds = array<i64: 2>, scalar_prefetch = 0 : i64, scratch_operands = 0 : i64, tpu.core_type = #tpu.core_type<tc>, window_params = [{transform_indices = @transform_0, window_bounds = array<i64: 3>}, {transform_indices = @transform_1, window_bounds = array<i64: 3, 8, 128>}, {transform_indices = @transform_2, window_bounds = array<i64: 8, 128>}, {transform_indices = @transform_3, window_bounds = array<i64: 8, 128>}, {transform_indices = @transform_4, window_bounds = array<i64: 3, 128>}, {transform_indices = @transform_5, window_bounds = array<i64: 1, 128>}, {transform_indices = @transform_6, window_bounds = array<i64: 8, 128>}]} {
    %c0 = arith.constant 0 : index
    %0 = memref.load %arg1[%c0] : memref<3xf32, #tpu.memory_space<smem>>
    %c1 = arith.constant 1 : index
    %1 = memref.load %arg1[%c1] : memref<3xf32, #tpu.memory_space<smem>>
    %c2 = arith.constant 2 : index
    %2 = memref.load %arg1[%c2] : memref<3xf32, #tpu.memory_space<smem>>
    %c0_0 = arith.constant 0 : index
    %c0_1 = arith.constant 0 : index
    %3 = vector.load %arg4[%c0_0, %c0_1] : memref<8x128xf32, #tpu.memory_space<vmem>>, vector<8x128xf32>
    %c0_2 = arith.constant 0 : index
    %c0_3 = arith.constant 0 : index
    %4 = vector.load %arg3[%c0_2, %c0_3] : memref<8x128xf32, #tpu.memory_space<vmem>>, vector<8x128xf32>
    %5 = tpu.iota {dimensions = array<i32: 0>} : vector<8x128xi32>
    %c7_i32 = arith.constant 7 : i32
    %6 = tpu.dynamic_rotate %3 by %c7_i32 dim 0 : vector<8x128xf32>, i32 -> vector<8x128xf32>
    %c7_i32_4 = arith.constant 7 : i32
    %7 = vector.broadcast %c7_i32_4 : i32 to vector<8x128xi32>
    %8 = arith.cmpi eq, %5, %7 : vector<8x128xi32>
    %9 = arith.subf %6, %3 : vector<8x128xf32>
    %cst = arith.constant 1.000000e+09 : f32
    %10 = vector.broadcast %cst : f32 to vector<8x128xf32>
    %11 = arith.select %8, %10, %9 : vector<8x128xi1>, vector<8x128xf32>
    %12 = vector.broadcast %0 : f32 to vector<8x128xf32>
    %13 = arith.mulf %4, %12 : vector<8x128xf32>
    %cst_5 = arith.constant 0.000000e+00 : f32
    %14 = vector.broadcast %cst_5 : f32 to vector<8x128xf32>
    %15 = arith.subf %14, %13 : vector<8x128xf32>
    %16 = arith.negf %15 : vector<8x128xf32>
    %17 = math.exp %16 : vector<8x128xf32>
    %cst_6 = arith.constant 1.000000e+00 : f32
    %18 = vector.broadcast %cst_6 : f32 to vector<8x128xf32>
    %19 = arith.addf %18, %17 : vector<8x128xf32>
    %20 = arith.divf %18, %19 : vector<8x128xf32>
    %21 = vector.broadcast %0 : f32 to vector<8x128xf32>
    %22 = arith.mulf %20, %21 : vector<8x128xf32>
    %cst_7 = arith.constant 0.000000e+00 : f32
    %23 = vector.broadcast %cst_7 : f32 to vector<8x128xf32>
    %24 = arith.subf %23, %22 : vector<8x128xf32>
    %25 = arith.mulf %24, %11 : vector<8x128xf32>
    %26 = math.exp %25 : vector<8x128xf32>
    %cst_8 = arith.constant 1.000000e+00 : f32
    %27 = vector.broadcast %cst_8 : f32 to vector<8x128xf32>
    %28 = arith.subf %27, %26 : vector<8x128xf32>
    %cst_9 = arith.constant 1.000000e+00 : f32
    %29 = vector.broadcast %cst_9 : f32 to vector<8x128xf32>
    %30 = arith.subf %29, %28 : vector<8x128xf32>
    %cst_10 = arith.constant 1.000000e-10 : f32
    %31 = vector.broadcast %cst_10 : f32 to vector<8x128xf32>
    %32 = arith.addf %30, %31 : vector<8x128xf32>
    %c1_i32 = arith.constant 1 : i32
    %33 = tpu.dynamic_rotate %32 by %c1_i32 dim 0 : vector<8x128xf32>, i32 -> vector<8x128xf32>
    %c1_i32_11 = arith.constant 1 : i32
    %34 = vector.broadcast %c1_i32_11 : i32 to vector<8x128xi32>
    %35 = arith.cmpi slt, %5, %34 : vector<8x128xi32>
    %cst_12 = arith.constant 1.000000e+00 : f32
    %36 = vector.broadcast %cst_12 : f32 to vector<8x128xf32>
    %37 = arith.select %35, %36, %33 : vector<8x128xi1>, vector<8x128xf32>
    %38 = arith.mulf %32, %37 : vector<8x128xf32>
    %c2_i32 = arith.constant 2 : i32
    %39 = tpu.dynamic_rotate %38 by %c2_i32 dim 0 : vector<8x128xf32>, i32 -> vector<8x128xf32>
    %c2_i32_13 = arith.constant 2 : i32
    %40 = vector.broadcast %c2_i32_13 : i32 to vector<8x128xi32>
    %41 = arith.cmpi slt, %5, %40 : vector<8x128xi32>
    %cst_14 = arith.constant 1.000000e+00 : f32
    %42 = vector.broadcast %cst_14 : f32 to vector<8x128xf32>
    %43 = arith.select %41, %42, %39 : vector<8x128xi1>, vector<8x128xf32>
    %44 = arith.mulf %38, %43 : vector<8x128xf32>
    %c4_i32 = arith.constant 4 : i32
    %45 = tpu.dynamic_rotate %44 by %c4_i32 dim 0 : vector<8x128xf32>, i32 -> vector<8x128xf32>
    %c4_i32_15 = arith.constant 4 : i32
    %46 = vector.broadcast %c4_i32_15 : i32 to vector<8x128xi32>
    %47 = arith.cmpi slt, %5, %46 : vector<8x128xi32>
    %cst_16 = arith.constant 1.000000e+00 : f32
    %48 = vector.broadcast %cst_16 : f32 to vector<8x128xf32>
    %49 = arith.select %47, %48, %45 : vector<8x128xi1>, vector<8x128xf32>
    %50 = arith.mulf %44, %49 : vector<8x128xf32>
    %c1_i32_17 = arith.constant 1 : i32
    %51 = tpu.dynamic_rotate %50 by %c1_i32_17 dim 0 : vector<8x128xf32>, i32 -> vector<8x128xf32>
    %c1_i32_18 = arith.constant 1 : i32
    %52 = vector.broadcast %c1_i32_18 : i32 to vector<8x128xi32>
    %53 = arith.cmpi slt, %5, %52 : vector<8x128xi32>
    %cst_19 = arith.constant 1.000000e+00 : f32
    %54 = vector.broadcast %cst_19 : f32 to vector<8x128xf32>
    %55 = arith.select %53, %54, %51 : vector<8x128xi1>, vector<8x128xf32>
    %56 = arith.mulf %28, %55 : vector<8x128xf32>
    %c0_20 = arith.constant 0 : index
    %c0_21 = arith.constant 0 : index
    %57 = vector.load %arg7[%c0_20, %c0_21] : memref<8x128xf32, #tpu.memory_space<vmem>>, vector<8x128xf32>
    tpu.vector_store %arg7[%c0_20, %c0_21], %56 {strides = array<i32>} : memref<8x128xf32, #tpu.memory_space<vmem>>, vector<8x128xf32>,
    %cst_22 = arith.constant dense<0.000000e+00> : vector<128xf32>
    %58 = vector.multi_reduction <add>, %56, %cst_22 [0] : vector<8x128xf32> to vector<128xf32>
    %59 = vector.shape_cast %58 : vector<128xf32> to vector<1x128xf32>
    %c0_23 = arith.constant 0 : index
    %c0_24 = arith.constant 0 : index
    %c0_25 = arith.constant 0 : index
    %60 = vector.load %arg2[%c0_23, %c0_24, %c0_25] : memref<3x8x128xf32, #tpu.memory_space<vmem>>, vector<1x8x128xf32>
    %61 = vector.shape_cast %60 : vector<1x8x128xf32> to vector<8x128xf32>
    %62 = arith.mulf %56, %61 : vector<8x128xf32>
    %cst_26 = arith.constant dense<0.000000e+00> : vector<128xf32>
    %63 = vector.multi_reduction <add>, %62, %cst_26 [0] : vector<8x128xf32> to vector<128xf32>
    %64 = vector.shape_cast %63 : vector<128xf32> to vector<1x128xf32>
    %c1_27 = arith.constant 1 : index
    %c0_28 = arith.constant 0 : index
    %c0_29 = arith.constant 0 : index
    %65 = vector.load %arg2[%c1_27, %c0_28, %c0_29] : memref<3x8x128xf32, #tpu.memory_space<vmem>>, vector<1x8x128xf32>
    %66 = vector.shape_cast %65 : vector<1x8x128xf32> to vector<8x128xf32>
    %67 = arith.mulf %56, %66 : vector<8x128xf32>
    %cst_30 = arith.constant dense<0.000000e+00> : vector<128xf32>
    %68 = vector.multi_reduction <add>, %67, %cst_30 [0] : vector<8x128xf32> to vector<128xf32>
    %69 = vector.shape_cast %68 : vector<128xf32> to vector<1x128xf32>
    %c2_31 = arith.constant 2 : index
    %c0_32 = arith.constant 0 : index
    %c0_33 = arith.constant 0 : index
    %70 = vector.load %arg2[%c2_31, %c0_32, %c0_33] : memref<3x8x128xf32, #tpu.memory_space<vmem>>, vector<1x8x128xf32>
    %71 = vector.shape_cast %70 : vector<1x8x128xf32> to vector<8x128xf32>
    %72 = arith.mulf %56, %71 : vector<8x128xf32>
    %cst_34 = arith.constant dense<0.000000e+00> : vector<128xf32>
    %73 = vector.multi_reduction <add>, %72, %cst_34 [0] : vector<8x128xf32> to vector<128xf32>
    %74 = vector.shape_cast %73 : vector<128xf32> to vector<1x128xf32>
    %75 = tpu.concatenate %64, %69, %74 in 0 : vector<1x128xf32>, vector<1x128xf32>, vector<1x128xf32> -> vector<3x128xf32>
    %cst_35 = arith.constant 1.000000e+00 : f32
    %76 = vector.broadcast %cst_35 : f32 to vector<3x128xf32>
    %77 = arith.addf %75, %76 : vector<3x128xf32>
    %78 = vector.broadcast %59 : vector<1x128xf32> to vector<3x128xf32>
    %79 = arith.subf %77, %78 : vector<3x128xf32>
    %cst_36 = arith.constant 2.000000e+00 : f32
    %80 = vector.broadcast %cst_36 : f32 to vector<3x128xf32>
    %81 = arith.mulf %79, %80 : vector<3x128xf32>
    %cst_37 = arith.constant 1.000000e+00 : f32
    %82 = vector.broadcast %cst_37 : f32 to vector<3x128xf32>
    %83 = arith.subf %81, %82 : vector<3x128xf32>
    %c0_38 = arith.constant 0 : index
    %c0_39 = arith.constant 0 : index
    %84 = vector.load %arg5[%c0_38, %c0_39] : memref<3x128xf32, #tpu.memory_space<vmem>>, vector<3x128xf32>
    tpu.vector_store %arg5[%c0_38, %c0_39], %83 {strides = array<i32>} : memref<3x128xf32, #tpu.memory_space<vmem>>, vector<3x128xf32>,
    %85 = arith.mulf %56, %3 : vector<8x128xf32>
    %cst_40 = arith.constant dense<0.000000e+00> : vector<128xf32>
    %86 = vector.multi_reduction <add>, %85, %cst_40 [0] : vector<8x128xf32> to vector<128xf32>
    %87 = vector.shape_cast %86 : vector<128xf32> to vector<1x128xf32>
    %cst_41 = arith.constant 1.000000e+00 : f32
    %88 = vector.broadcast %cst_41 : f32 to vector<1x128xf32>
    %89 = arith.subf %88, %59 : vector<1x128xf32>
    %90 = vector.extract_strided_slice %3 {offsets = [7, 0], sizes = [1, 128], strides = [1, 1]} : vector<8x128xf32> to vector<1x128xf32>
    %91 = arith.mulf %89, %90 : vector<1x128xf32>
    %92 = arith.addf %87, %91 : vector<1x128xf32>
    %93 = arith.divf %92, %59 : vector<1x128xf32>
    %94 = arith.cmpf one, %93, %93 : vector<1x128xf32>
    %cst_42 = arith.constant 0x7F800000 : f32
    %95 = vector.broadcast %cst_42 : f32 to vector<1x128xf32>
    %96 = arith.select %94, %95, %93 : vector<1x128xi1>, vector<1x128xf32>
    %97 = vector.broadcast %1 : f32 to vector<1x128xf32>
    %98 = arith.maximumf %97, %96 : vector<1x128xf32>
    %99 = vector.broadcast %2 : f32 to vector<1x128xf32>
    %100 = arith.minimumf %99, %98 : vector<1x128xf32>
    %c0_43 = arith.constant 0 : index
    %c0_44 = arith.constant 0 : index
    %101 = vector.load %arg6[%c0_43, %c0_44] : memref<1x128xf32, #tpu.memory_space<vmem>>, vector<1x128xf32>
    tpu.vector_store %arg6[%c0_43, %c0_44], %100 {strides = array<i32>} : memref<1x128xf32, #tpu.memory_space<vmem>>, vector<1x128xf32>,
    return
  }
  func.func @transform_0(%arg0: i32) -> i32 {
    %c0_i32 = arith.constant 0 : i32
    %c0_i32_0 = arith.constant 0 : i32
    return %c0_i32 : i32
  }
  func.func @transform_1(%arg0: i32) -> (i32, i32, i32) {
    %c0_i32 = arith.constant 0 : i32
    %c0_i32_0 = arith.constant 0 : i32
    %c0_i32_1 = arith.constant 0 : i32
    return %c0_i32, %c0_i32_0, %arg0 : i32, i32, i32
  }
  func.func @transform_2(%arg0: i32) -> (i32, i32) {
    %c0_i32 = arith.constant 0 : i32
    %c0_i32_0 = arith.constant 0 : i32
    return %c0_i32, %arg0 : i32, i32
  }
  func.func @transform_3(%arg0: i32) -> (i32, i32) {
    %c0_i32 = arith.constant 0 : i32
    %c0_i32_0 = arith.constant 0 : i32
    return %c0_i32, %arg0 : i32, i32
  }
  func.func @transform_4(%arg0: i32) -> (i32, i32) {
    %c0_i32 = arith.constant 0 : i32
    %c0_i32_0 = arith.constant 0 : i32
    return %c0_i32, %arg0 : i32, i32
  }
  func.func @transform_5(%arg0: i32) -> (i32, i32) {
    %c0_i32 = arith.constant 0 : i32
    %c0_i32_0 = arith.constant 0 : i32
    return %c0_i32, %arg0 : i32, i32
  }
  func.func @transform_6(%arg0: i32) -> (i32, i32) {
    %c0_i32 = arith.constant 0 : i32
    %c0_i32_0 = arith.constant 0 : i32
    return %c0_i32, %arg0 : i32, i32
  }
}

</mosaic_0001>

<bundles_post_ra>
// kernel: tpu_custom_call.1
= control target key start
LH: loop header
LB: loop body
LE: loop exit
PB: predicated region body
PF: predicated region fallthrough
CT: control target
= control target key end

     0   :  { %s1441_s0 = inlined_call_operand.hbm [shape: f32[3], index: 0, kind: input, shape index: {}]   ;;  %s1442_s1 = inlined_call_operand.hbm [shape: f32[3,8,256], index: 1, kind: input, shape index: {}]   ;;  %s1443_s2 = inlined_call_operand.hbm [shape: f32[8,256], index: 2, kind: input, shape index: {}]   ;;  %s1444_s3 = inlined_call_operand.hbm [shape: f32[8,256], index: 3, kind: input, shape index: {}]   ;;  %s1445_s4 = inlined_call_operand.hbm [shape: f32[3,256], index: 4, kind: output, shape index: {0}]   ;;  %s1446_s5 = inlined_call_operand.hbm [shape: f32[1,256], index: 5, kind: output, shape index: {1}]   ;;  %s1447_s6 = inlined_call_operand.hbm [shape: f32[8,256], index: 6, kind: output, shape index: {2}]  }
   0x1   :  { %1456 = sst [smem:[#allocation23_spill]] %s1441_s0 }
   0x2   :  { %1457 = sst [smem:[#allocation24_spill]] %s1442_s1 }
   0x3   :  { %1458 = sst [smem:[#allocation25_spill]] %s1443_s2 }
   0x4   :  { %12 = vsyncpa [#allocation5], 0 }
   0x5   :  { %13 = vsyncpa [#allocation3], 0 }
   0x6   :  { %15 = vsyncpa [#allocation3 + $0x1], 0 }
   0x7   :  { %16 = vsyncpa [#allocation8], 0 }
   0x8   :  { %18 = vsyncpa [#allocation8 + $0x1], 0 }
   0x9   :  { %19 = vsyncpa [#allocation4], 0 }
   0xa   :  { %21 = vsyncpa [#allocation4 + $0x1], 0 }
   0xb   :  { %22 = vsyncpa [#allocation12], 0 }
   0xc   :  { %24 = vsyncpa [#allocation12 + $0x1], 0  ;;  %s1139_s21 = smov 0   ;;  %s1141_s22 = smov 0  }
   0xd   :  { %s1143_s23 = smov 0   ;;  %s1145_s24 = smov 0  }
   0xe LB: > { %1459 = sst [smem:[#allocation19_spill]] %s1094_s23  ;;  %s1160_s25 = sadd.s32 1, %s1098_s24   ;;  %s1098_s24 = sphi %s1145_s24, %s1482_s24   ;;  %s1094_s23 = sphi %s1143_s23, %s1484_s23   ;;  %s1090_s22 = sphi %s1141_s22, %s1486_s22   ;;  %s1086_s21 = sphi %s1139_s21, %s1485_s21  }
   0xf   : > { %1460 = sst [smem:[#allocation20_spill]] %s1098_s24  ;;  %s58_s26 = sadd.s32 1, %s1094_s23 }
  0x10   : > { %1461 = sst [smem:[#allocation21_spill]] %s1160_s25  ;;  %s55_s27 = ssub.s32 %s1098_s24, %s1160_s25 }
  0x11   : > { %p65_p0 = scmp.ne.s32.totalorder %s1094_s23, %s1090_s22  ;;  %p56_p1 = scmp.eq.s32.totalorder %s55_s27, 0 }
  0x12   : > { %p66_p2 = scmp.eq.s32.totalorder %s1098_s24, 0  ;;  %p812_p4 = scmp.lt.s32.totalorder %s1098_s24, 2 }
  0x13   : > { %s1171_s28 = scalar_select %p56_p1, %s1094_s23, %s58_s26  }
  0x14   : > { %p67_p5 = por %p66_p2, %p65_p0  ;;  %s1177_s29 = sand.u32 1, %s1094_s23  }
  0x15   : > { %1462 = sst [smem:[#allocation22_spill]] %s1171_s28  ;;  %s769_s30 = smul.u32 24, %s1177_s29 }
  0x16   : > { %s1181_s7 = sshll.u32 %s1098_s24, 3  ;;  %p1183_p6 = pnand %p812_p4, %p67_p5 }
  0x17   : > { %s1464_s1 = sld [smem:[#allocation24_spill]]  ;;  %s239_s13 = scalar_lea.vmem [#allocation6], %s769_s30 }
  0x18   : > { %s246_s14 = sshll.u32 %s239_s13, 4  ;;  %s256_s15 = sand.u32 1, %s1098_s24   ;;  %s1194_s14 = int_to_ptr.vmem [resolvable:$true] %s246_s14 }
  0x19   : > { %s1449_s16 = sshll.u32 %s1177_s29, 3  ;;  %s1465_s2 = sld [smem:[#allocation25_spill]] }
  0x1a   : > { %s260_s26 = scalar_lea.vmem [#allocation7], %s1449_s16  ;;  %s1204_s9 = scalar_lea.sflag [#allocation8], %s256_s15 }
  0x1b   : > { %s268_s27 = sshll.u32 %s260_s26, 4  ;;  %p863_p8 = pneg %p1183_p6  ;;  %s269_s27 = int_to_ptr.vmem [resolvable:$true] %s268_s27 }
  0x1d   : > { %s243_s11 = scalar_lea.hbm %s1464_s1, %s1181_s7 }
  0x1e   : > { %s1191_s12 = sshll.u32 %s243_s11, 4  ;;  %s245_s12 = int_to_ptr.hbm [resolvable:$true] %s1191_s12 }
  0x1f   : > { %s264_s19 = scalar_lea.hbm %s1465_s2, %s1181_s7  ;;  %s866_s17 = scalar_lea.hbm %s1465_s2, 16 }
  0x20   : > { %s266_s20 = sshll.u32 %s264_s19, 4  ;;  %s267_s20 = int_to_ptr.hbm [resolvable:$true] %s266_s20 }
  0x21   : > { %s859_s30 = sshra.s32 %s267_s20, 4  ;;  %s860_s30 = int_to_ptr.hbm [resolvable:$true] %s859_s30 }
  0x22   : > { %s861_s10 = scalar_lea.hbm %s860_s30, 8  ;;  %p867_p11 = scmp.lt.s32.totalorder %s860_s30, %s1465_s2 }
  0x23   : > { %p862_p7 = scmp.ne.s32.totalorder %s860_s30, %s861_s10  ;;  %p868_p12 = scmp.lt.s32.totalorder %s866_s17, %s861_s10 }
  0x25   : > { %p864_p9 = pnand %p863_p8, %p862_p7  ;;  %p869_p13 = por %p868_p12, %p867_p11 }
  0x27   : > { %p865_p10 = pneg %p864_p9 }
  0x29   : > { %p870_p1 = pnand %p869_p13, %p865_p10 }
  0x2b   : > { %873 = shalt.err (!%p870_p1)
}
  0x2c   : > { %797 = dma.hbm_to_vmem [thread:$0]  (!%p1183_p6), %s267_s20, 128, %s269_s27, %s1204_s9  }
  0x2d   : > { %s1221_s15 = sadd.s32 4294967295, %s1098_s24   ;;  %s1448_s26 = sadd.s32 4294967294, %s1098_s24  }
  0x2e   : > { %p71_p2 = scmp.ne.s32.totalorder %s1090_s22, %s1086_s21  ;;  %p1451_p4 = scmp.eq.s32.totalorder %s1221_s15, 0 }
  0x2f   : > { %p147_p5 = scmp.eq.s32.totalorder %s1221_s15, 1  ;;  %p153_p7 = scmp.eq.s32.totalorder %s1448_s26, 1 }
  0x30   : > { %p743_p9 = scmp.ge.s32.totalorder %s1098_s24, 1  ;;  %p1233_p10 = por %p1451_p4, %p71_p2 }
  0x31   : > { %p1240_p11 = por %p147_p5, %p65_p0  ;;  %p1244_p12 = por %p153_p7, %p71_p2 }
  0x32   : > { %p212_p13 = scmp.lt.s32.totalorder %s1098_s24, 3  ;;  %s1469_s0 = sld [smem:[#allocation23_spill]] }
  0x33   : > { %s283_s26 = scalar_lea.hbm %s1444_s3, %s1181_s7  ;;  %s236_s10 = scalar_lea.sflag [#allocation3], %s1177_s29 }
  0x34   : > { %p1252_p1 = pnand %p743_p9, %p212_p13  ;;  %s1268_s2 = sshll.u32 %s283_s26, 4  ;;  %s286_s2 = int_to_ptr.hbm [resolvable:$true] %s1268_s2 }
  0x35   : > { %s889_s11 = sshra.s32 %s245_s12, 4  ;;  %s896_s7 = scalar_lea.hbm %s1464_s1, 48  ;;  %s890_s11 = int_to_ptr.hbm [resolvable:$true] %s889_s11 }
  0x36   : > { %p787_p0 = pneg %p1252_p1  ;;  %p897_p13 = scmp.lt.s32.totalorder %s890_s11, %s1464_s1 }
  0x38   : > { %s224_s13 = sshll.u32 %s1469_s0, 4  ;;  %p1264_p2 = pnand %p787_p0, %p1451_p4  ;;  %s225_s13 = int_to_ptr.hbm [resolvable:$true] %s224_s13 }
  0x39   : > { %s891_s0 = scalar_lea.hbm %s890_s11, 24 }
  0x3a   : > { %p892_p5 = scmp.ne.s32.totalorder %s890_s11, %s891_s0  ;;  %p898_p0 = scmp.lt.s32.totalorder %s896_s7, %s891_s0 }
  0x3c   : > { %p894_p7 = pnand %p892_p5, %p863_p8  ;;  %p899_p3 = por %p898_p0, %p897_p13 }
  0x3e   : > { %p895_p9 = pneg %p894_p7 }
  0x40   : > { %p900_p4 = pnand %p899_p3, %p895_p9 }
  0x42   : > { %903 = shalt.err (!%p900_p4)
}
  0x43   : > { %s1100_s26 = smov 256   ;;  %s1101_s25 = smov 128  }
  0x44   : > { %s1102_s24 = smov 8   ;;  %s1103_s23 = smov [#allocation2]  }
  0x45   : > { %794 = dma.hbm_to_vmem [thread:$0]  (!%p1183_p6), %s245_s12, 384, %s1194_s14, %s236_s10, %s1100_s26, %s1101_s25, %s1102_s24  }
  0x46   : > { %790 = dma.hbm_to_smem (!%p1264_p2), %s225_s13, 16, %s1103_s23, [#allocation5]  }
  0x47   : > { %s1472_s0 = sshll.u32 %s1177_s29, 3  ;;  %s934_s18 = sshra.s32 %s286_s2, 4  ;;  %s935_s18 = int_to_ptr.hbm [resolvable:$true] %s934_s18 }
  0x48   : > { %s279_s28 = scalar_lea.vmem [#allocation9], %s1472_s0  ;;  %s936_s7 = scalar_lea.hbm %s935_s18, 8 }
  0x49   : > { %s287_s11 = sshll.u32 %s279_s28, 4  ;;  %p937_p3 = scmp.ne.s32.totalorder %s935_s18, %s936_s7  ;;  %s288_s11 = int_to_ptr.vmem [resolvable:$true] %s287_s11 }
  0x4a   : > { %s941_s24 = scalar_lea.hbm %s1444_s3, 16  ;;  %p942_p2 = scmp.lt.s32.totalorder %s935_s18, %s1444_s3 }
  0x4b   : > { %p939_p4 = pnand %p937_p3, %p863_p8  ;;  %p943_p7 = scmp.lt.s32.totalorder %s941_s24, %s936_s7 }
  0x4d   : > { %p940_p5 = pneg %p939_p4  ;;  %p944_p9 = por %p943_p7, %p942_p2 }
  0x4f   : > { %p945_p13 = pnand %p944_p9, %p940_p5 }
  0x51   : > { %948 = shalt.err (!%p945_p13)
}
  0x52   : > { %800 = dma.hbm_to_vmem [thread:$0]  (!%p1183_p6), %s286_s2, 128, %s288_s11, %s1204_s9  }
  0x53   : > { %296 = sbr.rel (%p1252_p1) target bundleno = 235 (0xeb), region = 36  ;;  %p1473_p8 = scmp.eq.s32.totalorder (!%p1252_p1), %s1221_s15, 0 }
  0x58   : > { %1065 = dma.done.wait (%p1473_p8), [#allocation5], 16   ;;  %p1474_p0 = pmov %p1473_p8 }
  0x59   : > { %s1311_s1 = sand.u32 1, %s1090_s22  }
  0x5a   : > { %1067 = vsyncadd (%p1474_p0), [#allocation5], 4294967280  ;;  %s770_s29 = smul.u32 24, %s1311_s1  ;;  %s304_s14 = scalar_lea.sflag [#allocation3], %s1311_s1 }
  0x5c   : > { %s1315_s8 = scalar_lea.vmem [#allocation6], %s770_s29 }
  0x5d   : > { %1069 = dma.done.wait (%p1233_p10), %s304_s14, 384  }
  0x5e   : > { %1071 = vsyncadd (%p1233_p10), %s304_s14, 4294966912  ;;  %s313_s2 = sand.u32 1, %s1221_s15   ;;  %s1323_s16 = sshll.u32 %s1311_s1, 3 }
  0x5f   : > { %s314_s9 = scalar_lea.sflag [#allocation8], %s313_s2  ;;  %s317_s13 = scalar_lea.vmem [#allocation7], %s1323_s16 }
  0x60   : > { %1073 = dma.done.wait (%p1233_p10), %s314_s9, 256  }
  0x61   : > { %1075 = vsyncadd (%p1233_p10), %s314_s9, 4294967040  ;;  %s327_s17 = scalar_lea.vmem [#allocation9], %s1323_s16 }
  0x62   : > { %333 = sfence }
  0x63   : > { %s377_s10 = sld [smem:[#allocation2]]  ;;  %v381_v0 = vld [vmem:[%s317_s13] sm:$0xff]  ;;  %v1333_v8 = vld [vmem:[%s327_s17] sm:$0xff]  ;;  %v382_v9 = vlaneseq  ;;  %v760_v44 = vld [vmem:[%s1315_s8 + $0x8] sm:$0xff]  ;;  %s376_s30 = scalar_lea.vmem [#allocation13], %s1323_s16  ;;  %vm466_vm8 = vcmask 1040384  }
  0x64   : > { %v384_v14 = vrot.slane %v1333_v8, 1  ;;  %v440_v42 = vld [vmem:[%s1315_s8] sm:$0xff]  ;;  %v761_v45 = vld [vmem:[%s1315_s8 + $0x10] sm:$0xff]  ;;  %s755_s26 = sshll.u32 %s1311_s1, 2  ;;  %vm468_vm9 = vcmask 1041408   ;;  %s765_s23 = sshll.u32 %s1221_s15, 2 }
  0x65   : > { %v383_v15 = vshrl.u32 %v382_v9, 7  ;;  %s527_s11 = scalar_lea.hbm %s1445_s4, %s765_s23  ;;  %s363_s18 = scalar_lea.vmem [#allocation10], %s755_s26 }
  0x66   : > { %v386_v19 = vsub.f32 %v384_v14, %v1333_v8  ;;  %s529_s7 = sshll.u32 %s363_s18, 4  ;;  %s531_s19 = sshll.u32 %s527_s11, 4  ;;  %s530_s7 = int_to_ptr.vmem [resolvable:$true] %s529_s7  ;;  %s532_s19 = int_to_ptr.hbm [resolvable:$true] %s531_s19 }
  0x67   : > { %vm385_vm4 = vcmp.eq.s32.totalorder %v383_v15, 7  ;;  %vm419_vm5 = vcmp.lt.s32.totalorder %v383_v15, 1  ;;  %vm423_vm6 = vcmp.lt.s32.totalorder %v383_v15, 2  ;;  %vm427_vm7 = vcmp.lt.s32.totalorder %v383_v15, 4  ;;  %s1350_s24 = sld [smem:[#allocation2 + $0x1]]  ;;  %s508_s12 = scalar_lea.sflag [#allocation4], %s1311_s1 }
  0x68   : > { %v387_v23 = vsel %vm385_vm4, 1e+09, %v386_v19  ;;  %s1352_s25 = sld [smem:[#allocation2 + $0x2]]  ;;  %s978_s29 = sshra.s32 %s532_s19, 4  ;;  %s979_s29 = int_to_ptr.hbm [resolvable:$true] %s978_s29 }
  0x69   : > { %v388_v1 = vstv %s377_s10  ;;  %s980_s14 = scalar_lea.hbm %s979_s29, 4  ;;  %s984_s13 = scalar_lea.hbm %s1445_s4, 8 }
  0x6a   : > { %v389_v2 = vmul.f32 %v388_v1, %v381_v0  ;;  %p981_p6 = scmp.ne.s32.totalorder %s979_s29, %s980_s14  ;;  %p985_p3 = scmp.lt.s32.totalorder %s979_s29, %s1445_s4 }
  0x6b   : > { %p986_p4 = scmp.lt.s32.totalorder %s984_s13, %s980_s14 }
  0x6c   : > { %v390_v3 = vsub.f32 0.0, %v389_v2  ;;  %p982_p10 = pnand %p981_p6, %p1240_p11 }
  0x6d   : > { %p987_p5 = por %p986_p4, %p985_p3 }
  0x6e   : > { %v759_v4 = vmul.f32 -1.442695, %v390_v3  ;;  %p983_p1 = pneg %p982_p10 }
  0x70   : > { %851 = vpow2.f32 %v759_v4  ;;  %p988_p2 = pnand %p987_p5, %p983_p1 }
  0x76   : > { %v852_v5 = vpop.eup %851 }
  0x77   : > { %v394_v6 = vadd.f32 1.0, %v852_v5 }
  0x79   : > { %853 = vrcp.f32 %v394_v6  ;;  %v406_v11 = vand.u32 2147483648, %v394_v6  ;;  %vm400_vm0 = vweird.f32 %v394_v6  ;;  %v404_v13 = vand.u32 2147483647, %v394_v6 }
  0x7b   : > { %v407_v17 = vor.u32 1.1754944e-38, %v406_v11  ;;  %vm405_vm3 = vcmp.eq.f32.partialorder %v404_v13, 8.507059e+37 }
  0x7f   : > { %v854_v7 = vpop.eup %853 }
  0x80   : > { %v396_v10 = vmul.f32 %v854_v7, %v394_v6  ;;  %vm401_vm1 = vweird.f32 %v854_v7 }
  0x81   : > { %vm402_vm2 = vmor %vm400_vm0, %vm401_vm1 }
  0x82   : > { %v397_v12 = vsub.f32 1.0, %v396_v10 }
  0x84   : > { %v398_v16 = vmul.f32 %v854_v7, %v397_v12 }
  0x86   : > { %v399_v18 = vadd.f32 %v854_v7, %v398_v16 }
  0x88   : > { %v403_v20 = vsel %vm402_vm2, %v854_v7, %v399_v18 }
  0x89   : > { %v408_v21 = vsel %vm405_vm3, %v407_v17, %v403_v20 }
  0x8a   : > { %v410_v22 = vmul.f32 %v408_v21, %v388_v1 }
  0x8c   : > { %v411_v24 = vsub.f32 0.0, %v410_v22 }
  0x8e   : > { %v412_v25 = vmul.f32 %v411_v24, %v387_v23 }
  0x90   : > { %v413_v26 = vmul.f32 1.442695, %v412_v25 }
  0x92   : > { %855 = vpow2.f32 %v413_v26 }
  0x98   : > { %v856_v27 = vpop.eup %855 }
  0x99   : > { %v415_v28 = vsub.f32 1.0, %v856_v27 }
  0x9b   : > { %v416_v29 = vsub.f32 1.0, %v415_v28 }
  0x9d   : > { %v417_v30 = vadd.f32 1e-10, %v416_v29 }
  0x9f   : > { %v418_v31 = vrot.slane %v417_v30, 7 }
  0xa1   : > { %v420_v32 = vsel %vm419_vm5, 1.0, %v418_v31 }
  0xa2   : > { %v421_v33 = vmul.f32 %v420_v32, %v417_v30 }
  0xa4   : > { %v422_v34 = vrot.slane %v421_v33, 6 }
  0xa6   : > { %v424_v35 = vsel %vm423_vm6, 1.0, %v422_v34 }
  0xa7   : > { %v425_v36 = vmul.f32 %v424_v35, %v421_v33 }
  0xa9   : > { %v426_v37 = vrot.slane %v425_v36, 4 }
  0xab   : > { %v428_v38 = vsel %vm427_vm7, 1.0, %v426_v37 }
  0xac   : > { %v429_v39 = vmul.f32 %v428_v38, %v425_v36 }
  0xae   : > { %v430_v40 = vrot.slane %v429_v39, 7 }
  0xb0   : > { %v431_v41 = vsel %vm419_vm5, 1.0, %v430_v40 }
  0xb1   : > { %v432_v43 = vmul.f32 %v431_v41, %v415_v28 }
  0xb3   : > { %v434_v46 = vrot.slane %v432_v43, 4  ;;  %v475_v47 = vmul.f32 %v432_v43, %v1333_v8  ;;  %433 = vst [vmem:[%s376_s30] sm:$0xff] %v432_v43  ;;  %v441_v48 = vmul.f32 %v440_v42, %v432_v43  ;;  %v450_v49 = vmul.f32 %v760_v44, %v432_v43 }
  0xb4   : > { %v459_v50 = vmul.f32 %v761_v45, %v432_v43 }
  0xb5   : > { %v435_v51 = vadd.f32 %v434_v46, %v432_v43  ;;  %v476_v52 = vrot.slane %v475_v47, 4  ;;  %v442_v53 = vrot.slane %v441_v48, 4  ;;  %v451_v54 = vrot.slane %v450_v49, 4 }
  0xb6   : > { %v460_v55 = vrot.slane %v459_v50, 4 }
  0xb7   : > { %v436_v56 = vrot.slane %v435_v51, 2  ;;  %v477_v57 = vadd.f32 %v476_v52, %v475_v47  ;;  %v443_v58 = vadd.f32 %v442_v53, %v441_v48  ;;  %v452_v59 = vadd.f32 %v451_v54, %v450_v49 }
  0xb8   : > { %v461_v60 = vadd.f32 %v460_v55, %v459_v50 }
  0xb9   : > { %v437_v61 = vadd.f32 %v436_v56, %v435_v51  ;;  %v444_v62 = vrot.slane %v443_v58, 2  ;;  %v453_v63 = vrot.slane %v452_v59, 2  ;;  %v478_v2 = vrot.slane %v477_v57, 2 }
  0xba   : > { %v462_v0 = vrot.slane %v461_v60, 2 }
  0xbb   : > { %v438_v1 = vrot.slane %v437_v61, 1  ;;  %v445_v3 = vadd.f32 %v444_v62, %v443_v58  ;;  %v454_v4 = vadd.f32 %v453_v63, %v452_v59  ;;  %v479_v11 = vadd.f32 %v478_v2, %v477_v57 }
  0xbc   : > { %v463_v5 = vadd.f32 %v462_v0, %v461_v60 }
  0xbd   : > { %v439_v6 = vadd.f32 %v438_v1, %v437_v61  ;;  %v446_v7 = vrot.slane %v445_v3, 1  ;;  %v455_v9 = vrot.slane %v454_v4, 1  ;;  %v480_v16 = vrot.slane %v479_v11, 1 }
  0xbe   : > { %v464_v10 = vrot.slane %v463_v5, 1 }
  0xbf   : > { %857 = vrcp.f32 %v439_v6  ;;  %v447_v12 = vadd.f32 %v446_v7, %v445_v3  ;;  %v456_v13 = vadd.f32 %v455_v9, %v454_v4  ;;  %v482_v18 = vsub.f32 1.0, %v439_v6 }
  0xc0   : > { %v465_v14 = vadd.f32 %v464_v10, %v463_v5  ;;  %v481_v23 = vadd.f32 %v480_v16, %v479_v11  ;;  %vm490_vm10 = vweird.f32 %v439_v6  ;;  %v494_v24 = vand.u32 2147483647, %v439_v6 }
  0xc1   : > { %v467_v15 = vsel %vm466_vm8, %v447_v12, %v456_v13  ;;  %v496_v25 = vand.u32 2147483648, %v439_v6  ;;  %v483_v26 = vmul.f32 %v482_v18, %v1333_v8 }
  0xc2   : > { %v469_v17 = vsel %vm468_vm9, %v467_v15, %v465_v14  ;;  %vm1358_vm13 = vcmp.eq.f32.partialorder %v494_v24, 8.507059e+37 }
  0xc3   : > { %v470_v19 = vadd.f32 1.0, %v469_v17  ;;  %v497_v32 = vor.u32 1.1754944e-38, %v496_v25  ;;  %v484_v33 = vadd.f32 %v483_v26, %v481_v23 }
  0xc5   : > { %v858_v20 = vpop.eup %857  ;;  %v471_v22 = vsub.f32 %v470_v19, %v439_v6 }
  0xc6   : > { %v486_v21 = vmul.f32 %v858_v20, %v439_v6  ;;  %vm491_vm11 = vweird.f32 %v858_v20 }
  0xc7   : > { %v472_v28 = vmul.f32 2.0, %v471_v22  ;;  %vm1354_vm12 = vmor %vm490_vm10, %vm491_vm11 }
  0xc8   : > { %v487_v27 = vsub.f32 1.0, %v486_v21 }
  0xc9   : > { %v762_v30 = vadd.f32 -1.0, %v472_v28 }
  0xca   : > { %v488_v29 = vmul.f32 %v858_v20, %v487_v27 }
  0xcb   : > { %474 = vst [vmem:[%s363_s18] sm:$0x7] %v762_v30 }
  0xcc   : > { %v489_v8 = vadd.f32 %v858_v20, %v488_v29 }
  0xcd   : > { %991 = shalt.err (!%p988_p2)
}
  0xce   : > { %781 = dma.vmem_to_hbm [thread:$0]  (%p1240_p11), %s530_s7, 64, %s532_s19, %s508_s12   ;;  %v493_v35 = vsel %vm1354_vm12, %v858_v20, %v489_v8  ;;  %v502_v38 = vstv %s1350_s24  ;;  %v504_v40 = vstv %s1352_s25 }
  0xcf   : > { %s766_s26 = sshll.u32 %s1221_s15, 3  ;;  %v498_v36 = vsel %vm1358_vm13, %v497_v32, %v493_v35  ;;  %s540_s28 = scalar_lea.hbm %s1446_s5, %s1221_s15 }
  0xd0   : > { %v499_v37 = vmul.f32 %v498_v36, %v484_v33  ;;  %s554_s29 = scalar_lea.hbm %s1447_s6, %s766_s26  ;;  %s369_s7 = scalar_lea.vmem [#allocation11], %s1311_s1 }
  0xd1   : > { %s542_s19 = sshll.u32 %s369_s7, 4  ;;  %s544_s12 = sshll.u32 %s540_s28, 4  ;;  %s543_s19 = int_to_ptr.vmem [resolvable:$true] %s542_s19  ;;  %s545_s12 = int_to_ptr.hbm [resolvable:$true] %s544_s12 }
  0xd2   : > { %vm500_vm14 = vcmp.ne.f32.partialorder %v499_v37, %v499_v37  ;;  %s1390_s14 = sshll.u32 %s376_s30, 4  ;;  %s558_s8 = sshll.u32 %s554_s29, 4  ;;  %s557_s14 = int_to_ptr.vmem [resolvable:$true] %s1390_s14  ;;  %s1393_s8 = int_to_ptr.hbm [resolvable:$true] %s558_s8 }
  0xd3   : > { %v501_v39 = vsel %vm500_vm14, inf, %v499_v37  ;;  %s513_s1 = scalar_lea.sflag [#allocation12], %s313_s2  ;;  %s1006_s24 = sshra.s32 %s545_s12, 4  ;;  %s1007_s24 = int_to_ptr.hbm [resolvable:$true] %s1006_s24 }
  0xd4   : > { %v503_v41 = vmax.f32 %v502_v38, %v501_v39  ;;  %s1008_s25 = scalar_lea.hbm %s1007_s24, 1  ;;  %s1012_s9 = scalar_lea.hbm %s1446_s5, 2 }
  0xd5   : > { %p1009_p7 = scmp.ne.s32.totalorder %s1007_s24, %s1008_s25  ;;  %p1013_p8 = scmp.lt.s32.totalorder %s1007_s24, %s1446_s5 }
  0xd6   : > { %v505_v42 = vmin.f32 %v504_v40, %v503_v41  ;;  %p1014_p0 = scmp.lt.s32.totalorder %s1012_s9, %s1008_s25 }
  0xd7   : > { %p1010_p9 = pnand %p1009_p7, %p1240_p11 }
  0xd8   : > { %506 = vst [vmem:[%s369_s7 - $0x7] sm:$0x80] %v505_v42  ;;  %p1015_p6 = por %p1014_p0, %p1013_p8 }
  0xd9   : > { %p1011_p13 = pneg %p1010_p9 }
  0xdb   : > { %p1016_p10 = pnand %p1015_p6, %p1011_p13 }
  0xdd   : > { %1019 = shalt.err (!%p1016_p10)
}
  0xde   : > { %782 = dma.vmem_to_hbm [thread:$0]  (%p1240_p11), %s543_s19, 16, %s545_s12, %s513_s1  }
  0xdf   : > { %s1034_s15 = sshra.s32 %s1393_s8, 4  ;;  %s1040_s23 = scalar_lea.hbm %s1447_s6, 16  ;;  %s1035_s15 = int_to_ptr.hbm [resolvable:$true] %s1034_s15 }
  0xe0   : > { %s1036_s2 = scalar_lea.hbm %s1035_s15, 8  ;;  %p1041_p5 = scmp.lt.s32.totalorder %s1035_s15, %s1447_s6 }
  0xe1   : > { %p1037_p1 = scmp.ne.s32.totalorder %s1035_s15, %s1036_s2  ;;  %p1042_p2 = scmp.lt.s32.totalorder %s1040_s23, %s1036_s2 }
  0xe3   : > { %p1038_p3 = pnand %p1037_p1, %p1240_p11  ;;  %p1043_p7 = por %p1042_p2, %p1041_p5 }
  0xe5   : > { %p1039_p4 = pneg %p1038_p3 }
  0xe7   : > { %p1044_p9 = pnand %p1043_p7, %p1039_p4 }
  0xe9   : > { %1047 = shalt.err (!%p1044_p9)
}
  0xea   : > { %783 = dma.vmem_to_hbm [thread:$0]  (%p1240_p11), %s557_s14, 128, %s1393_s8, %s513_s1  }
  0xeb PF: > { %s1479_s11 = sld [smem:[#allocation20_spill]]  ;;  %s570_s18 = sand.u32 1, %s1086_s21  }
  0xec   : > { %s571_s29 = scalar_lea.sflag [#allocation4], %s570_s18 }
  0xf1   : > { %p1480_p13 = scmp.ge.s32.totalorder %s1479_s11, 2 }
  0xf3   : > { %p802_p8 = pnand %p1480_p13, %p1244_p12 }
  0xf5   : > { %p803_p0 = pneg %p802_p8 }
  0xf7   : > { %1077 = dma.done.wait (%p803_p0), %s571_s29, 64  }
  0xf8   : > { %1079 = vsyncadd (%p803_p0), %s571_s29, 4294967232  ;;  %s1481_s7 = sadd.s32 4294967294, %s1479_s11  }
  0xf9   : > { %s580_s19 = sand.u32 1, %s1481_s7  }
  0xfa   : > { %s581_s20 = scalar_lea.sflag [#allocation12], %s580_s19 }
  0xfb   : > { %1081 = dma.done.wait (%p803_p0), %s581_s20, 144  }
  0xfc   : > { %1083 = vsyncadd (%p803_p0), %s581_s20, 4294967152  ;;  %s1482_s24 = sld [smem:[#allocation21_spill]]  ;;  %s1485_s21 = smov %s1090_s22 }
  0xfd   : > { %s1483_s12 = sld [smem:[#allocation19_spill]] }
  0xfe   : > { %s1484_s23 = sld [smem:[#allocation22_spill]] }
 0x102   : > { %p27_p11 = scmp.ge.s32.totalorder %s1482_s24, 4  }
 0x103   : > { %s1486_s22 = smov %s1483_s12 }
 0x104   :  { %29 = sbr.rel (!%p27_p11) target bundleno = 14 (0xe), region = 144 }
 0x109   :  { %596 = vsyncpa [#allocation3], 1 }
 0x10a   :  { %598 = vsyncpa [#allocation3 + $0x1], 1 }
 0x10b   :  { %599 = vsyncpa [#allocation8], 1 }
 0x10c   :  { %601 = vsyncpa [#allocation8 + $0x1], 1 }
 0x10d   :  { %602 = vsyncpa [#allocation4], 1 }
 0x10e   :  { %604 = vsyncpa [#allocation4 + $0x1], 1 }
 0x10f   :  { %605 = vsyncpa [#allocation12], 1 }
 0x110   :  { %607 = vsyncpa [#allocation12 + $0x1], 1 }
 0x111   :  { %608 = vsyncpa [#allocation5], 1 }
 0x112   :  { %610 = vsyncpa [#allocation5 + $0x1], 1 }

</bundles_post_ra>
